<compile_context>
chip_gen: v6e
topology: v6e:2x2x1
jax: 0.10.0
libtpu: 0.0.40
codegen_flags: <defaults>
</compile_context>

<pallas_src>
import functools

import numpy as np
import jax
import jax.numpy as jnp
from jax.experimental import pallas as pl
from jax.experimental.pallas import tpu as pltpu


# ----------------------------------------------------------------------------
# Kernel 1: patch embedding  (p @ W + b, append cls token LAST, add pos embed)
# ----------------------------------------------------------------------------
def patch_embed_kernel(p_ref, w_ref, b_ref, cls_ref, pos_ref, o_ref,
                       *, b_size, n_real_patches):
    P = n_real_patches
    B = b_size
    Tp, Dp = pos_ref.shape

    mapped = jnp.dot(p_ref[...].astype(jnp.bfloat16), w_ref[...],
                     preferred_element_type=jnp.float32) + b_ref[...]   # (B*P, Dp)
    mapped3 = mapped.reshape(B, P, Dp)

    # patch tokens
    o_ref[:, :P, :] = mapped3 + pos_ref[:P, :]
    # cls token appended LAST (index P), matching the PyTorch reference
    cls_row = (cls_ref[...] + pos_ref[P:P + 1, :]).reshape(1, 1, Dp)
    o_ref[:, P:P + 1, :] = jnp.broadcast_to(cls_row, (B, 1, Dp))
    # padded token rows -> zeros
    o_ref[:, P + 1:, :] = jnp.zeros((B, Tp - (P + 1), Dp), jnp.float32)


def patch_embed(p_pad, w, b, cls, pos, b_size, n_patches):
    BP, PDp = p_pad.shape
    Tp, Dp = pos.shape
    kernel = functools.partial(patch_embed_kernel, b_size=b_size,
                               n_real_patches=n_patches)
    full2 = lambda i: (0, 0)
    return pl.pallas_call(
        kernel,
        out_shape=jax.ShapeDtypeStruct((b_size, Tp, Dp), jnp.float32),
        grid=(1,),
        in_specs=[
            pl.BlockSpec((BP, PDp), full2),
            pl.BlockSpec(w.shape, full2),
            pl.BlockSpec(b.shape, full2),
            pl.BlockSpec(cls.shape, full2),
            pl.BlockSpec(pos.shape, full2),
        ],
        out_specs=pl.BlockSpec((b_size, Tp, Dp), lambda i: (0, 0, 0)),
        compiler_params=pltpu.CompilerParams(dimension_semantics=("arbitrary",)),
    )(p_pad, w, b, cls, pos)


# ----------------------------------------------------------------------------
# Kernel 2: the WHOLE encoder stack in one pallas_call, grid=(n_encoder,).
#   Token slab (B*Tp, Dp) stays resident in the output VMEM block across the
#   layer axis; per-layer weights are streamed in via squeezed BlockSpecs.
# ----------------------------------------------------------------------------
def encoder_stack_kernel(x_ref, ln1g_ref, ln1b_ref, wqkv_ref, bqkv_ref,
                         wo_ref, bo_ref, ln2g_ref, ln2b_ref,
                         w1_ref, b1_ref, w2_ref, b2_ref,
                         o_ref, attn_scr,
                         *, n_heads, d_real, dh_real, b_size, t_real):
    # Load the initial tokens into the resident output block on layer 0 only.
    @pl.when(pl.program_id(0) == 0)
    def _():
        o_ref[...] = x_ref[...]

    x = o_ref[...]                                  # (M, Dp) f32 running state
    M, Dp = x.shape
    B = b_size
    Tp = M // B
    dhp = Dp // n_heads
    eps = 1e-5
    inv_d = 1.0 / float(d_real)

    # lane mask for the real model dim (padded lanes are zero in x/params)
    dmask = jax.lax.broadcasted_iota(jnp.int32, (1, Dp), 1) < d_real

    def layernorm(y, g_ref, bias_ref):
        mu = jnp.sum(y, axis=-1, keepdims=True) * inv_d
        yc = jnp.where(dmask, y - mu, 0.0)
        var = jnp.sum(yc * yc, axis=-1, keepdims=True) * inv_d
        return yc * jax.lax.rsqrt(var + eps) * g_ref[...] + bias_ref[...]

    # ---- LayerNorm 1 + fused QKV projection (bf16 matmul, f32 accumulate) ----
    h = layernorm(x, ln1g_ref, ln1b_ref)
    qkv = jnp.dot(h.astype(jnp.bfloat16), wqkv_ref[...],
                  preferred_element_type=jnp.float32) + bqkv_ref[...]   # (M, 3Dp)
    qkv3 = qkv.reshape(B, Tp, 3 * Dp)
    q3 = qkv3[:, :, 0 * Dp:1 * Dp]
    k3 = qkv3[:, :, 1 * Dp:2 * Dp]
    v3 = qkv3[:, :, 2 * Dp:3 * Dp]

    scale = 1.0 / float(np.sqrt(dh_real))
    # key mask: padded key tokens must not be attended to
    kmask = jax.lax.broadcasted_iota(jnp.int32, (1, 1, Tp), 2) < t_real

    # ---- Multi-head self attention (batched over B per head) ----
    for hd in range(n_heads):
        sl = slice(hd * dhp, (hd + 1) * dhp)
        qh = (q3[:, :, sl] * scale).astype(jnp.bfloat16)        # (B, Tp, dhp)
        kh = k3[:, :, sl].astype(jnp.bfloat16)
        vh = v3[:, :, sl].astype(jnp.bfloat16)
        s = jnp.einsum('bqd,bkd->bqk', qh, kh,
                       preferred_element_type=jnp.float32)      # (B, Tp, Tp)
        s = jnp.where(kmask, s, -1e30)
        s = s - jnp.max(s, axis=-1, keepdims=True)
        e = jnp.exp(s)
        p = e * pl.reciprocal(jnp.sum(e, axis=-1, keepdims=True), approx=True)
        oh = jnp.einsum('bqk,bkd->bqd', p.astype(jnp.bfloat16), vh,
                        preferred_element_type=jnp.float32)     # (B, Tp, dhp)
        attn_scr[:, :, sl] = oh

    attn = attn_scr[...].reshape(M, Dp)
    attn = jnp.dot(attn.astype(jnp.bfloat16), wo_ref[...],
                   preferred_element_type=jnp.float32) + bo_ref[...]
    x1 = x + attn                                              # residual 1

    # ---- LayerNorm 2 + GELU MLP ----
    h2 = layernorm(x1, ln2g_ref, ln2b_ref)
    m = jnp.dot(h2.astype(jnp.bfloat16), w1_ref[...],
                preferred_element_type=jnp.float32) + b1_ref[...]
    m = jax.nn.gelu(m, approximate=True)                       # tanh-approx GELU
    m = jnp.dot(m.astype(jnp.bfloat16), w2_ref[...],
                preferred_element_type=jnp.float32) + b2_ref[...]

    o_ref[...] = x1 + m                                        # residual 2


_ENC_NAMES = ("ln1_g", "ln1_b", "wqkv", "bqkv", "wo", "bo",
              "ln2_g", "ln2_b", "w1", "b1", "w2", "b2")


def encoder_stack_forward(x, enc, *, n_layers, n_heads, d_real, dh_real,
                          b_size, t_real):
    M, Dp = x.shape
    weights = [enc[n] for n in _ENC_NAMES]          # each: (L,) + per-layer shape
    tok_spec = pl.BlockSpec((M, Dp), lambda l: (0, 0))

    in_specs = [tok_spec]
    for w in weights:
        s = w.shape[1:]
        in_specs.append(
            pl.BlockSpec((None,) + s, lambda l, nd=len(s): (l,) + (0,) * nd))

    kernel = functools.partial(encoder_stack_kernel, n_heads=n_heads,
                               d_real=d_real, dh_real=dh_real,
                               b_size=b_size, t_real=t_real)
    return pl.pallas_call(
        kernel,
        out_shape=jax.ShapeDtypeStruct((M, Dp), jnp.float32),
        grid=(n_layers,),
        in_specs=in_specs,
        out_specs=tok_spec,
        scratch_shapes=[pltpu.VMEM((b_size, M // b_size, Dp), jnp.float32)],
        compiler_params=pltpu.CompilerParams(dimension_semantics=("arbitrary",)),
    )(x, *weights)


# ----------------------------------------------------------------------------
# Kernel 3: final head  (Linear -> Softmax) applied to token 0
# ----------------------------------------------------------------------------
def head_kernel(x_ref, w_ref, b_ref, o_ref, *, f_real):
    logits = jnp.dot(x_ref[...].astype(jnp.bfloat16), w_ref[...],
                     preferred_element_type=jnp.float32) + b_ref[...]
    Fp = logits.shape[-1]
    fmask = jax.lax.broadcasted_iota(jnp.int32, (1, Fp), 1) < f_real
    logits = jnp.where(fmask, logits, -1e30)
    logits = logits - jnp.max(logits, axis=-1, keepdims=True)
    e = jnp.exp(logits)
    o_ref[...] = e / jnp.sum(e, axis=-1, keepdims=True)   # exact divide (output)


def head_forward(x_cls, wf, bf, f_real):
    B, Dp = x_cls.shape
    Fp = wf.shape[1]
    full2 = lambda i: (0, 0)
    kernel = functools.partial(head_kernel, f_real=f_real)
    return pl.pallas_call(
        kernel,
        out_shape=jax.ShapeDtypeStruct((B, Fp), jnp.float32),
        grid=(1,),
        in_specs=[pl.BlockSpec((B, Dp), full2),
                  pl.BlockSpec((Dp, Fp), full2),
                  pl.BlockSpec((1, Fp), full2)],
        out_specs=pl.BlockSpec((B, Fp), full2),
    )(x_cls, wf, bf)


# ----------------------------------------------------------------------------
# Parameter init (torch-Linear-style uniform) + lane/sublane padding layout
# ----------------------------------------------------------------------------
def _pad_to(a, shape):
    out = np.zeros(shape, np.float32)
    out[tuple(slice(0, s) for s in a.shape)] = np.asarray(a, np.float32)
    return out


def init_params(key, cfg):
    D, F, H = cfg["mapping_dim"], cfg["final_dim"], cfg["n_heads"]
    PD = cfg["patch_dim"]
    T = cfg["n_patch"] ** 2 + 1
    dh = D // H
    Dp, Fp, PDp = cfg["d_pad"], cfg["f_pad"], cfg["pd_pad"]
    Hidp, Tp = cfg["hid_pad"], cfg["t_pad"]
    dhp = Dp // H
    assert Dp % H == 0 and dhp >= dh

    keys = iter(jax.random.split(key, 64))

    def lin(k, fin, fout):
        kw, kb = jax.random.split(k)
        lim = 1.0 / np.sqrt(fin)
        w = np.asarray(jax.random.uniform(kw, (fin, fout), jnp.float32, -lim, lim))
        b = np.asarray(jax.random.uniform(kb, (1, fout), jnp.float32, -lim, lim))
        return w, b

    def head_pack_cols(w, b):       # heads laid out along padded output columns
        wp = np.zeros((Dp, Dp), np.float32)
        bp = np.zeros((1, Dp), np.float32)
        for h in range(H):
            wp[:D, h * dhp:h * dhp + dh] = w[:, h * dh:(h + 1) * dh]
            bp[0, h * dhp:h * dhp + dh] = b[0, h * dh:(h + 1) * dh]
        return wp, bp

    def head_pack_rows(w):          # heads laid out along padded input rows
        wp = np.zeros((Dp, Dp), np.float32)
        for h in range(H):
            wp[h * dhp:h * dhp + dh, :D] = w[h * dh:(h + 1) * dh, :]
        return wp

    params = {}

    w_patch, b_patch = lin(next(keys), PD, D)
    params["w_patch"] = jnp.asarray(_pad_to(w_patch, (PDp, Dp)), jnp.bfloat16)
    params["b_patch"] = jnp.asarray(_pad_to(b_patch, (1, Dp)))

    cls = np.asarray(jax.random.normal(next(keys), (1, D), jnp.float32))
    params["cls"] = jnp.asarray(_pad_to(cls, (1, Dp)))

    # sinusoidal positional embedding (same formula as the reference)
    pos = np.zeros((Tp, Dp), np.float32)
    for patch in range(T):
        for d in range(D):
            if d % 2 == 0:
                pos[patch, d] = np.sin(patch / 10000 ** (d / D))
            else:
                pos[patch, d] = np.cos(patch / 10000 ** ((d - 1) / D))
    params["pos"] = jnp.asarray(pos)

    # per-layer encoder weights, stacked along a leading layer axis
    per_layer = {n: [] for n in _ENC_NAMES}
    for _ in range(cfg["n_encoder"]):
        wq, bq = lin(next(keys), D, D)
        wk, bk = lin(next(keys), D, D)
        wv, bv = lin(next(keys), D, D)
        wo, bo = lin(next(keys), D, D)
        w1, b1 = lin(next(keys), D, 4 * D)
        w2, b2 = lin(next(keys), 4 * D, D)

        wq_p, bq_p = head_pack_cols(wq, bq)
        wk_p, bk_p = head_pack_cols(wk, bk)
        wv_p, bv_p = head_pack_cols(wv, bv)
        layer = {
            "ln1_g": _pad_to(np.ones((1, D)), (1, Dp)),
            "ln1_b": np.zeros((1, Dp), np.float32),
            "ln2_g": _pad_to(np.ones((1, D)), (1, Dp)),
            "ln2_b": np.zeros((1, Dp), np.float32),
            "wqkv": np.concatenate([wq_p, wk_p, wv_p], 1),
            "bqkv": np.concatenate([bq_p, bk_p, bv_p], 1),
            "wo": head_pack_rows(wo),
            "bo": _pad_to(bo, (1, Dp)),
            "w1": _pad_to(w1, (Dp, Hidp)),
            "b1": _pad_to(b1, (1, Hidp)),
            "w2": _pad_to(w2, (Hidp, Dp)),
            "b2": _pad_to(b2, (1, Dp)),
        }
        for n in _ENC_NAMES:
            per_layer[n].append(layer[n])

    bf16_names = {"wqkv", "wo", "w1", "w2"}
    params["enc"] = {
        n: jnp.asarray(np.stack(per_layer[n], 0),
                       jnp.bfloat16 if n in bf16_names else jnp.float32)
        for n in _ENC_NAMES
    }

    wf, bf = lin(next(keys), D, F)
    params["wf"] = jnp.asarray(_pad_to(wf, (Dp, Fp)), jnp.bfloat16)
    params["bf"] = jnp.asarray(_pad_to(bf, (1, Fp)))
    return params


# ----------------------------------------------------------------------------
# Full forward pass
# ----------------------------------------------------------------------------
def vit_forward(x, params, cfg):
    b, c, W, H = x.shape
    assert c == cfg["input_frame_size"][0]
    assert W == cfg["input_frame_size"][1]
    assert H == cfg["input_frame_size"][2]
    npch = cfg["n_patch"]
    ph, pw = W // npch, H // npch
    P = npch * npch
    PD = c * ph * pw
    PDp, Dp, Tp = cfg["pd_pad"], cfg["d_pad"], cfg["t_pad"]

    # einops: 'b c (p1 h) (p2 w) -> b (p1 p2) (c h w)'
    p = x.reshape(b, c, npch, ph, npch, pw)
    p = jnp.transpose(p, (0, 2, 4, 1, 3, 5)).reshape(b, P, PD)
    p_pad = jnp.pad(p.reshape(b * P, PD), ((0, 0), (0, PDp - PD)))

    tokens3 = patch_embed(p_pad, params["w_patch"], params["b_patch"],
                          params["cls"], params["pos"], b, P)
    tokens = tokens3.reshape(b * Tp, Dp)          # flattened lane-dense slab

    tokens = encoder_stack_forward(
        tokens, params["enc"],
        n_layers=cfg["n_encoder"], n_heads=cfg["n_heads"],
        d_real=cfg["mapping_dim"], dh_real=cfg["mapping_dim"] // cfg["n_heads"],
        b_size=b, t_real=P + 1)

    # reference takes out[:, 0] (first patch token) before the final head
    x_tok0 = tokens.reshape(b, Tp, Dp)[:, 0, :]
    out_pad = head_forward(x_tok0, params["wf"], params["bf"], cfg["final_dim"])
    return out_pad[:, :cfg["final_dim"]]


# ----------------------------------------------------------------------------
if __name__ == "__main__":
    def _rup(x, m):
        return ((x + m - 1) // m) * m

    cfg = dict(
        mapping_dim=16,
        n_patch=4,
        input_frame_size=(1, 16, 16),
        n_encoder=2,
        n_heads=4,
        final_dim=16,
    )
    cfg["patch_dim"] = (cfg["input_frame_size"][0]
                        * (cfg["input_frame_size"][1] // cfg["n_patch"])
                        * (cfg["input_frame_size"][2] // cfg["n_patch"]))
    cfg["d_pad"] = _rup(cfg["mapping_dim"], 128)
    cfg["pd_pad"] = _rup(cfg["patch_dim"], 128)
    cfg["hid_pad"] = _rup(4 * cfg["mapping_dim"], 128)
    cfg["f_pad"] = _rup(cfg["final_dim"], 128)
    cfg["t_pad"] = _rup(cfg["n_patch"] ** 2 + 1, 8)

    key = jax.random.PRNGKey(0)
    k_x, k_p = jax.random.split(key)
    x = jax.random.normal(k_x, (2,) + cfg["input_frame_size"], jnp.float32)
    params = init_params(k_p, cfg)

    out = vit_forward(x, params, cfg)
    out = jax.block_until_ready(out)

    assert out.shape == (2, cfg["final_dim"])
    assert bool(jnp.all(jnp.isfinite(out)))
    # softmax rows should sum to ~1
    assert bool(jnp.allclose(jnp.sum(out, axis=-1), 1.0, atol=1e-4))
    print("KERNEL_OK")
</pallas_src>

<mosaic_0001>
module attributes {stable_mosaic.version = 11 : i64} {
  func.func @patch_embed_kernel(%arg0: i32, %arg1: memref<32x128xf32, #tpu.memory_space<vmem>>, %arg2: memref<128x128xbf16, #tpu.memory_space<vmem>>, %arg3: memref<1x128xf32, #tpu.memory_space<vmem>>, %arg4: memref<1x128xf32, #tpu.memory_space<vmem>>, %arg5: memref<24x128xf32, #tpu.memory_space<vmem>>, %arg6: memref<2x24x128xf32, #tpu.memory_space<vmem>>) attributes {dimension_semantics = [#tpu.dimension_semantics<arbitrary>], iteration_bounds = array<i64: 1>, scalar_prefetch = 0 : i64, scratch_operands = 0 : i64, tpu.core_type = #tpu.core_type<tc>, window_params = [{pipeline_mode = #tpu.pipeline_mode<synchronous>, transform_indices = @transform_0, window_bounds = array<i64: 32, 128>}, {pipeline_mode = #tpu.pipeline_mode<synchronous>, transform_indices = @transform_1, window_bounds = array<i64: 128, 128>}, {pipeline_mode = #tpu.pipeline_mode<synchronous>, transform_indices = @transform_2, window_bounds = array<i64: 1, 128>}, {pipeline_mode = #tpu.pipeline_mode<synchronous>, transform_indices = @transform_3, window_bounds = array<i64: 1, 128>}, {pipeline_mode = #tpu.pipeline_mode<synchronous>, transform_indices = @transform_4, window_bounds = array<i64: 24, 128>}, {pipeline_mode = #tpu.pipeline_mode<synchronous>, transform_indices = @transform_5, window_bounds = array<i64: 2, 24, 128>}]} {
    %c0 = arith.constant 0 : index
    %c0_0 = arith.constant 0 : index
    %0 = vector.load %arg1[%c0, %c0_0] : memref<32x128xf32, #tpu.memory_space<vmem>>, vector<32x128xf32>
    %1 = arith.truncf %0 : vector<32x128xf32> to vector<32x128xbf16>
    %c0_1 = arith.constant 0 : index
    %c0_2 = arith.constant 0 : index
    %2 = vector.load %arg2[%c0_1, %c0_2] : memref<128x128xbf16, #tpu.memory_space<vmem>>, vector<128x128xbf16>
    %cst = arith.constant dense<0.000000e+00> : vector<32x128xf32>
    %3 = tpu.matmul %1, %2, %cst {dimension_numbers = #tpu.dot_dimension_numbers<[1], [0], [0], [1], [0, 0, 1, 1], [], []>} : vector<32x128xbf16>, vector<128x128xbf16>, vector<32x128xf32> -> vector<32x128xf32>
    %c0_3 = arith.constant 0 : index
    %c0_4 = arith.constant 0 : index
    %4 = vector.load %arg3[%c0_3, %c0_4] : memref<1x128xf32, #tpu.memory_space<vmem>>, vector<1x128xf32>
    %5 = vector.broadcast %4 : vector<1x128xf32> to vector<32x128xf32>
    %6 = arith.addf %3, %5 : vector<32x128xf32>
    %7 = vector.shape_cast %6 : vector<32x128xf32> to vector<2x16x128xf32>
    %c0_5 = arith.constant 0 : index
    %c0_6 = arith.constant 0 : index
    %8 = vector.load %arg5[%c0_5, %c0_6] : memref<24x128xf32, #tpu.memory_space<vmem>>, vector<16x128xf32>
    %9 = vector.shape_cast %8 : vector<16x128xf32> to vector<1x16x128xf32>
    %10 = vector.broadcast %9 : vector<1x16x128xf32> to vector<2x16x128xf32>
    %11 = arith.addf %7, %10 : vector<2x16x128xf32>
    %c0_7 = arith.constant 0 : index
    %c0_8 = arith.constant 0 : index
    %c0_9 = arith.constant 0 : index
    %12 = vector.load %arg6[%c0_7, %c0_8, %c0_9] : memref<2x24x128xf32, #tpu.memory_space<vmem>>, vector<2x16x128xf32>
    tpu.vector_store %arg6[%c0_7, %c0_8, %c0_9], %11 {strides = array<i32>} : memref<2x24x128xf32, #tpu.memory_space<vmem>>, vector<2x16x128xf32>,
    %c0_10 = arith.constant 0 : index
    %c0_11 = arith.constant 0 : index
    %13 = vector.load %arg4[%c0_10, %c0_11] : memref<1x128xf32, #tpu.memory_space<vmem>>, vector<1x128xf32>
    %c16 = arith.constant 16 : index
    %c0_12 = arith.constant 0 : index
    %14 = vector.load %arg5[%c16, %c0_12] : memref<24x128xf32, #tpu.memory_space<vmem>>, vector<1x128xf32>
    %15 = arith.addf %13, %14 : vector<1x128xf32>
    %16 = vector.shape_cast %15 : vector<1x128xf32> to vector<1x1x128xf32>
    %17 = vector.shape_cast %16 : vector<1x1x128xf32> to vector<1x1x128xf32>
    %18 = vector.broadcast %17 : vector<1x1x128xf32> to vector<2x1x128xf32>
    %c0_13 = arith.constant 0 : index
    %c16_14 = arith.constant 16 : index
    %c0_15 = arith.constant 0 : index
    %19 = vector.load %arg6[%c0_13, %c16_14, %c0_15] : memref<2x24x128xf32, #tpu.memory_space<vmem>>, vector<2x1x128xf32>
    tpu.vector_store %arg6[%c0_13, %c16_14, %c0_15], %18 {strides = array<i32>} : memref<2x24x128xf32, #tpu.memory_space<vmem>>, vector<2x1x128xf32>,
    %cst_16 = arith.constant 0.000000e+00 : f32
    %20 = vector.broadcast %cst_16 : f32 to vector<2x7x128xf32>
    %c0_17 = arith.constant 0 : index
    %c17 = arith.constant 17 : index
    %c0_18 = arith.constant 0 : index
    %21 = vector.load %arg6[%c0_17, %c17, %c0_18] : memref<2x24x128xf32, #tpu.memory_space<vmem>>, vector<2x7x128xf32>
    tpu.vector_store %arg6[%c0_17, %c17, %c0_18], %20 {strides = array<i32>} : memref<2x24x128xf32, #tpu.memory_space<vmem>>, vector<2x7x128xf32>,
    return
  }
  func.func @transform_0(%arg0: i32) -> (i32, i32) {
    %c0_i32 = arith.constant 0 : i32
    %c0_i32_0 = arith.constant 0 : i32
    %c0_i32_1 = arith.constant 0 : i32
    return %c0_i32, %c0_i32_0 : i32, i32
  }
  func.func @transform_1(%arg0: i32) -> (i32, i32) {
    %c0_i32 = arith.constant 0 : i32
    %c0_i32_0 = arith.constant 0 : i32
    %c0_i32_1 = arith.constant 0 : i32
    return %c0_i32, %c0_i32_0 : i32, i32
  }
  func.func @transform_2(%arg0: i32) -> (i32, i32) {
    %c0_i32 = arith.constant 0 : i32
    %c0_i32_0 = arith.constant 0 : i32
    %c0_i32_1 = arith.constant 0 : i32
    return %c0_i32, %c0_i32_0 : i32, i32
  }
  func.func @transform_3(%arg0: i32) -> (i32, i32) {
    %c0_i32 = arith.constant 0 : i32
    %c0_i32_0 = arith.constant 0 : i32
    %c0_i32_1 = arith.constant 0 : i32
    return %c0_i32, %c0_i32_0 : i32, i32
  }
  func.func @transform_4(%arg0: i32) -> (i32, i32) {
    %c0_i32 = arith.constant 0 : i32
    %c0_i32_0 = arith.constant 0 : i32
    %c0_i32_1 = arith.constant 0 : i32
    return %c0_i32, %c0_i32_0 : i32, i32
  }
  func.func @transform_5(%arg0: i32) -> (i32, i32, i32) {
    %c0_i32 = arith.constant 0 : i32
    %c0_i32_0 = arith.constant 0 : i32
    %c0_i32_1 = arith.constant 0 : i32
    %c0_i32_2 = arith.constant 0 : i32
    return %c0_i32, %c0_i32_0, %c0_i32_1 : i32, i32, i32
  }
}

</mosaic_0001>

<bundles_post_ra>
// kernel: tpu_custom_call.1
= control target key start
LH: loop header
LB: loop body
LE: loop exit
PB: predicated region body
PF: predicated region fallthrough
CT: control target
= control target key end

     0   :  { %10 = vsyncpa [#allocation3], 0  ;;  %s432_s0 = inlined_call_operand.hbm [shape: f32[32,128], index: 0, kind: input, shape index: {}]   ;;  %s433_s1 = inlined_call_operand.hbm [shape: bf16[128,128], index: 1, kind: input, shape index: {}]   ;;  %s434_s2 = inlined_call_operand.vmem [shape: f32[1,128], index: 2, kind: input, shape index: {}]   ;;  %s435_s3 = inlined_call_operand.vmem [shape: f32[1,128], index: 3, kind: input, shape index: {}]   ;;  %s436_s4 = inlined_call_operand.hbm [shape: f32[24,128], index: 4, kind: input, shape index: {}]   ;;  %s437_s5 = inlined_call_operand.hbm [shape: f32[2,24,128], index: 5, kind: output, shape index: {}]  }
   0x1   :  { %11 = vsyncpa [#allocation6], 0 }
   0x2   :  { %12 = vsyncpa [#allocation4], 0  ;;  %s366_s18 = smov [#allocation5]  }
   0x3   :  { %s30_s19 = sshll.u32 %s366_s18, 4  ;;  %s31_s19 = int_to_ptr.vmem [resolvable:$true] %s30_s19 }
   0x4   :  { %s288_s20 = scalar_lea.vmem %s31_s19, 1024  ;;  %p293_p1 = scmp.lt.s32.totalorder %s31_s19, %s31_s19 }
   0x5   :  { %p289_p0 = scmp.ne.s32.totalorder %s31_s19, %s288_s20  ;;  %p294_p2 = scmp.lt.s32.totalorder %s288_s20, %s288_s20 }
   0x7   :  { %p295_p3 = por %p294_p2, %p293_p1 }
   0x9   :  { %p296_p4 = pnand %p295_p3, %p289_p0 }
   0xb   :  { %299 = shalt.err (!%p296_p4)
}
   0xc   :  { %s367_s21 = smov 64   ;;  %s368_s22 = smov 4  }
   0xd   :  { %36 = dma.hbm_to_vmem [thread:$0]  %s433_s1, 1024, %s31_s19, [#allocation6], %s367_s21, %s367_s21, %s368_s22  }
   0xe   :  { %s369_s25 = smov [#allocation2]  }
   0xf   :  { %s18_s26 = sshll.u32 %s369_s25, 4  ;;  %s19_s26 = int_to_ptr.vmem [resolvable:$true] %s18_s26 }
  0x10   :  { %s308_s27 = scalar_lea.vmem %s19_s26, 512  ;;  %p313_p6 = scmp.lt.s32.totalorder %s19_s26, %s19_s26 }
  0x11   :  { %p309_p5 = scmp.ne.s32.totalorder %s19_s26, %s308_s27  ;;  %p314_p7 = scmp.lt.s32.totalorder %s308_s27, %s308_s27 }
  0x13   :  { %p315_p8 = por %p314_p7, %p313_p6 }
  0x15   :  { %p316_p9 = pnand %p315_p8, %p309_p5 }
  0x17   :  { %319 = shalt.err (!%p316_p9)
}
  0x18   :  { %s370_s28 = smov 128   ;;  %s371_s29 = smov 8  }
  0x19   :  { %24 = dma.hbm_to_vmem [thread:$0]  %s432_s0, 512, %s19_s26, [#allocation3], %s370_s28, %s370_s28, %s371_s29  }
  0x1a   :  { %s372_s1 = smov [#allocation7]  }
  0x1b   :  { %s46_s7 = sshll.u32 %s372_s1, 4  ;;  %s47_s7 = int_to_ptr.vmem [resolvable:$true] %s46_s7 }
  0x1c   :  { %s328_s8 = scalar_lea.vmem %s47_s7, 384  ;;  %p333_p11 = scmp.lt.s32.totalorder %s47_s7, %s47_s7 }
  0x1d   :  { %p329_p10 = scmp.ne.s32.totalorder %s47_s7, %s328_s8  ;;  %p334_p12 = scmp.lt.s32.totalorder %s328_s8, %s328_s8 }
  0x1f   :  { %p335_p13 = por %p334_p12, %p333_p11 }
  0x21   :  { %p336_p0 = pnand %p335_p13, %p329_p10 }
  0x23   :  { %339 = shalt.err (!%p336_p0)
}
  0x24   :  { %52 = dma.hbm_to_vmem [thread:$0]  %s436_s4, 384, %s47_s7, [#allocation6], %s370_s28, %s370_s28, %s371_s29  }
  0x25   :  { %360 = dma.done.wait [#allocation3], 512  }
  0x26   :  { %361 = vsyncadd [#allocation3], 4294966784 }
  0x27   :  { %362 = dma.done.wait [#allocation6], 1408  }
  0x28   :  { %363 = vsyncadd [#allocation6], 4294965888  ;;  %v272_v0 = vld [vmem:[#allocation5 + $0x38] sm:$0xff]   ;;  %v273_v1 = vld [vmem:[#allocation5 + $0x30] sm:$0xff]   ;;  %v373_v17 = vmov 0.0  }
  0x29   :  { %243 = vmatprep.subr.bf16.mxu0 %v272_v0  ;;  %v274_v2 = vld [vmem:[#allocation5 + $0x28] sm:$0xff]   ;;  %v275_v3 = vld [vmem:[#allocation5 + $0x20] sm:$0xff]   ;;  %v276_v7 = vld [vmem:[#allocation5 + $0x18] sm:$0xff]   ;;  %204 = vst [vmem:[#allocation8 + $0x11] sm:$0x7f] %v373_v17 }
  0x2a   :  { %244 = vmatpush3.bf16.msra.mxu0 %v272_v0  ;;  %v63_v4 = vld [vmem:[#allocation2] sm:$0xff]  ;;  %v64_v5 = vld [vmem:[#allocation2 + $0x8] sm:$0xff]  ;;  %v277_v8 = vld [vmem:[#allocation5 + $0x10] sm:$0xff]   ;;  %205 = vst [vmem:[#allocation8 + $0x29] sm:$0x7f] %v373_v17 }
  0x2b   :  { %245 = vmatprep.subr.bf16.mxu0 %v273_v1  ;;  %v67_v6 = vpack.c.bf16 %v64_v5, %v63_v4  ;;  %v278_v9 = vld [vmem:[#allocation5 + $0x8] sm:$0xff]   ;;  %v279_v10 = vld [vmem:[#allocation5] sm:$0xff]   ;;  %v65_v11 = vld [vmem:[#allocation2 + $0x10] sm:$0xff] }
  0x2c   :  { %v66_v12 = vld [vmem:[#allocation2 + $0x18] sm:$0xff]  ;;  %v199_v14 = vld [vmem:[%s435_s3] sm:$0x1]  ;;  %v200_v15 = vld [vmem:[#allocation7 + $0x10] sm:$0x1]  ;;  %s374_s3 = smov [#allocation8]  }
  0x2d   :  { %259 = vmatprep.mubr.bf16.mxu0 %v67_v6  ;;  %v68_v13 = vpack.c.bf16 %v66_v12, %v65_v11  ;;  %v201_v16 = vadd.f32 %v200_v15, %v199_v14  ;;  %v224_v18 = vld [vmem:[%s434_s2] ss:$0 sm:$0xff]  ;;  %v190_v26 = vld [vmem:[#allocation7 + $0x8] sm:$0xff]  ;;  %s211_s13 = sshll.u32 %s374_s3, 4  ;;  %s212_s13 = int_to_ptr.vmem [resolvable:$true] %s211_s13 }
  0x2e   :  { %246 = vmatpush3.bf16.msra.mxu0 %v273_v1  ;;  %v189_v20 = vld [vmem:[#allocation7] sm:$0xff]  ;;  %s340_s2 = scalar_lea.vmem %s212_s13, 768  ;;  %p345_p2 = scmp.lt.s32.totalorder %s212_s13, %s212_s13 }
  0x2f   :  { %247 = vmatprep.subr.bf16.mxu0 %v274_v2  ;;  %202 = vst [vmem:[#allocation8 + $0x10] sm:$0x1] %v201_v16  ;;  %203 = vst [vmem:[#allocation8 + $0x28] sm:$0x1] %v201_v16  ;;  %p341_p1 = scmp.ne.s32.totalorder %s212_s13, %s340_s2  ;;  %p346_p3 = scmp.lt.s32.totalorder %s340_s2, %s340_s2 }
  0x31   :  { %p347_p4 = por %p346_p3, %p345_p2 }
  0x32   :  { %248 = vmatpush3.bf16.msra.mxu0 %v274_v2 }
  0x33   :  { %249 = vmatprep.subr.bf16.mxu0 %v275_v3  ;;  %p348_p5 = pnand %p347_p4, %p341_p1 }
  0x36   :  { %250 = vmatpush3.bf16.msra.mxu0 %v275_v3 }
  0x37   :  { %251 = vmatprep.subr.bf16.mxu0 %v276_v7 }
  0x3a   :  { %252 = vmatpush3.bf16.msra.mxu0 %v276_v7 }
  0x3b   :  { %253 = vmatprep.subr.bf16.mxu0 %v277_v8 }
  0x3e   :  { %254 = vmatpush3.bf16.msra.mxu0 %v277_v8 }
  0x3f   :  { %255 = vmatprep.subr.bf16.mxu0 %v278_v9 }
  0x42   :  { %256 = vmatpush3.bf16.msra.mxu0 %v278_v9 }
  0x43   :  { %257 = vmatprep.subr.bf16.mxu0 %v279_v10 }
  0x46   :  { %258 = vmatpush3.bf16.msra.mxu0 %v279_v10 }
  0x49   :  { %260 = vmatmul.mubr.bf16.vlgmr.msra.gmra.mxu0 %v68_v13 }
 0x109   :  { %v261_v19 = vpop.f32.mrf.mxu0 }
 0x10a   :  { %v183_v21 = vadd.f32 %v261_v19, %v224_v18 }
 0x10b   :  { %v174_v22 = vpop.f32.mrf.mxu0 }
 0x10c   :  { %v193_v23 = vadd.f32 %v189_v20, %v183_v21  ;;  %v175_v24 = vadd.f32 %v224_v18, %v174_v22 }
 0x10d   :  { %v262_v25 = vpop.f32.mrf.mxu0 }
 0x10e   :  { %197 = vst [vmem:[#allocation8 + $0x18] sm:$0xff] %v193_v23  ;;  %v191_v27 = vadd.f32 %v189_v20, %v175_v24  ;;  %v186_v28 = vadd.f32 %v262_v25, %v224_v18 }
 0x10f   :  { %v177_v29 = vpop.f32.mrf.mxu0 }
 0x110   :  { %195 = vst [vmem:[#allocation8] sm:$0xff] %v191_v27  ;;  %v194_v30 = vadd.f32 %v190_v26, %v186_v28  ;;  %v178_v31 = vadd.f32 %v224_v18, %v177_v29 }
 0x112   :  { %198 = vst [vmem:[#allocation8 + $0x20] sm:$0xff] %v194_v30  ;;  %v192_v32 = vadd.f32 %v190_v26, %v178_v31 }
 0x114   :  { %196 = vst [vmem:[#allocation8 + $0x8] sm:$0xff] %v192_v32 }
 0x115   :  { %351 = shalt.err (!%p348_p5)
}
 0x116   :  { %217 = dma.vmem_to_hbm [thread:$0]  %s212_s13, 768, %s437_s5, [#allocation4], %s370_s28, %s370_s28, %s371_s29  }
 0x117   :  { %364 = dma.done.wait [#allocation4], 768  }
 0x118   :  { %365 = vsyncadd [#allocation4], 4294966528 }
 0x119   :  { %221 = vsyncpa [#allocation3], 1 }
 0x11a   :  { %222 = vsyncpa [#allocation6], 1 }
 0x11b   :  { %223 = vsyncpa [#allocation4], 1 }

</bundles_post_ra>
